<compile_context>
chip_gen: v6e
topology: v6e:2x2x1
jax: 0.10.0
libtpu: 0.0.40
codegen_flags: <defaults>
</compile_context>

<pallas_src>
import functools

import jax
import jax.numpy as jnp
from jax.experimental import pallas as pl
from jax.experimental.pallas import tpu as pltpu


def tabular_nn_kernel(x_ref, w1_ref, b1_ref, w2_ref, b2_ref, w3_ref, b3_ref, o_ref):
    # x_ref: (tile_b, F) row-major block (bf16 or f32 in HBM).
    x = x_ref[...].astype(jnp.float32)   # compute/accumulate in f32
    xt = x.T                             # (F, tile_b): batch onto lanes (XLU)

    # fc1 + ReLU: (64, F) @ (F, tile_b) -> (64, tile_b), lane-dense
    h1 = jnp.dot(w1_ref[...], xt, preferred_element_type=jnp.float32) + b1_ref[...]
    h1 = jnp.maximum(h1, 0.0)

    # dropout(p=0.3): identity on the eval / shap_mode inference path.
    # TODO(synk): training-mode stochastic dropout not implemented (would use
    #             pltpu.prng_seed + pltpu.prng_random_bits).

    # fc2 + ReLU: (32, 64) @ (64, tile_b) -> (32, tile_b)
    h2 = jnp.dot(w2_ref[...], h1, preferred_element_type=jnp.float32) + b2_ref[...]
    h2 = jnp.maximum(h2, 0.0)

    # fc3 (logits): (C, 32) @ (32, tile_b) -> (C, tile_b), lane-dense output
    out = jnp.dot(w3_ref[...], h2, preferred_element_type=jnp.float32) + b3_ref[...]
    o_ref[...] = out.astype(o_ref.dtype)


def _chip_budget():
    """(max batch tile, scoped-VMEM limit) keyed on the local TPU generation."""
    try:
        kind = jax.devices()[0].device_kind.lower()
    except Exception:
        kind = ""
    if "v7" in kind or "7x" in kind:
        return 16384, 48 * 1024 * 1024      # v7x: 64 MiB VMEM per TensorCore
    if any(t in kind for t in ("v4", "v5", "v6")):
        return 32768, 100 * 1024 * 1024     # 128 MiB physical VMEM
    return 4096, 32 * 1024 * 1024           # unknown chip: stay conservative


def _pick_tile_b(B, cap):
    # One full-array block whenever it fits (always a legal block shape);
    # otherwise the largest 128-multiple cap with a masked partial last block.
    return B if B <= cap else cap


@functools.partial(jax.jit, static_argnames=("tile_b",))
def tabular_nn_forward(x, params, tile_b=None):
    """x: (B, input_size) float32 or bfloat16. Returns (B, num_classes) float32."""
    B, F = x.shape
    C = params["w3"].shape[0]

    cap, vmem_limit = _chip_budget()
    if tile_b is None:
        tile_b = _pick_tile_b(B, cap)
    n_tiles = pl.cdiv(B, tile_b)

    def const_spec(arr):
        # full array, same block every grid step -> DMA'd once, VMEM-resident
        return pl.BlockSpec(arr.shape, lambda i: (0, 0))

    flops = 2 * B * (F * 64 + 64 * 32 + 32 * C)
    bytes_accessed = (int(x.size) * x.dtype.itemsize + B * C * 4
                      + sum(int(p.size) * p.dtype.itemsize for p in params.values()))

    out_t = pl.pallas_call(
        tabular_nn_kernel,
        out_shape=jax.ShapeDtypeStruct((C, B), jnp.float32),
        grid_spec=pl.GridSpec(
            grid=(n_tiles,),
            in_specs=[
                pl.BlockSpec((tile_b, F), lambda i: (i, 0)),   # x tile (streamed)
                const_spec(params["w1"]), const_spec(params["b1"]),
                const_spec(params["w2"]), const_spec(params["b2"]),
                const_spec(params["w3"]), const_spec(params["b3"]),
            ],
            out_specs=pl.BlockSpec((C, tile_b), lambda i: (0, i)),
        ),
        compiler_params=pltpu.CompilerParams(
            dimension_semantics=("parallel",),       # megacore sharding on v7x
            vmem_limit_bytes=vmem_limit,
        ),
        cost_estimate=pl.CostEstimate(
            flops=flops, transcendentals=0, bytes_accessed=bytes_accessed),
    )(x, params["w1"], params["b1"], params["w2"], params["b2"],
      params["w3"], params["b3"])

    # Tiny (C, B) -> (B, C) transpose on the logits only, inside the same jit.
    return out_t.T


def init_params(key, input_size, num_classes):
    """nn.Linear-style init U(-1/sqrt(fan_in), +1/sqrt(fan_in)).
    Weights in PyTorch layout (out_features, in_features); bias (out_features, 1)."""
    def linear(k, fan_in, fan_out):
        kw, kb = jax.random.split(k)
        bound = 1.0 / jnp.sqrt(jnp.float32(fan_in))
        w = jax.random.uniform(kw, (fan_out, fan_in), jnp.float32, -bound, bound)
        b = jax.random.uniform(kb, (fan_out, 1), jnp.float32, -bound, bound)
        return w, b

    k1, k2, k3 = jax.random.split(key, 3)
    w1, b1 = linear(k1, input_size, 64)
    w2, b2 = linear(k2, 64, 32)
    w3, b3 = linear(k3, 32, num_classes)
    return {"w1": w1, "b1": b1, "w2": w2, "b2": b2, "w3": w3, "b3": b3}


def reference_forward(x, params):
    h1 = jnp.maximum(x @ params["w1"].T + params["b1"].T, 0.0)
    h2 = jnp.maximum(h1 @ params["w2"].T + params["b2"].T, 0.0)
    return h2 @ params["w3"].T + params["b3"].T


if __name__ == "__main__":
    input_size, num_classes = 16, 4
    key = jax.random.PRNGKey(0)
    kx1, kx2, kx3, kp = jax.random.split(key, 4)
    params = init_params(kp, input_size, num_classes)

    # 1) tiny batch: single full-array block.
    B = 8
    x1 = jax.random.normal(kx1, (B, input_size), jnp.float32)
    out1 = jax.block_until_ready(tabular_nn_forward(x1, params))
    ref1 = reference_forward(x1, params)
    assert out1.shape == (B, num_classes)
    assert jnp.allclose(out1, ref1, atol=1e-4, rtol=1e-4)

    # 2) non-128-multiple batch with a forced small tile so the multi-step grid
    #    and masked partial last block (1000 = 3*256 + 232) are exercised.
    B = 1000
    x2 = jax.random.normal(kx2, (B, input_size), jnp.float32)
    out2 = jax.block_until_ready(tabular_nn_forward(x2, params, tile_b=256))
    ref2 = reference_forward(x2, params)
    assert out2.shape == (B, num_classes)
    assert jnp.allclose(out2, ref2, atol=1e-4, rtol=1e-4)

    # 3) bf16 input path (halves the dominant HBM stream); auto tile picker.
    B = 1024
    x3 = jax.random.normal(kx3, (B, input_size), jnp.float32).astype(jnp.bfloat16)
    out3 = jax.block_until_ready(tabular_nn_forward(x3, params))
    ref3 = reference_forward(x3.astype(jnp.float32), params)
    assert out3.shape == (B, num_classes)
    assert jnp.allclose(out3, ref3, atol=1e-2, rtol=1e-2)

    print("KERNEL_OK")
</pallas_src>

<mosaic_0001>
module attributes {stable_mosaic.version = 11 : i64} {
  func.func @tabular_nn_kernel(%arg0: i32, %arg1: memref<8x16xf32, #tpu.memory_space<vmem>>, %arg2: memref<64x16xf32, #tpu.memory_space<vmem>>, %arg3: memref<64x1xf32, #tpu.memory_space<vmem>>, %arg4: memref<32x64xf32, #tpu.memory_space<vmem>>, %arg5: memref<32x1xf32, #tpu.memory_space<vmem>>, %arg6: memref<4x32xf32, #tpu.memory_space<vmem>>, %arg7: memref<4x1xf32, #tpu.memory_space<vmem>>, %arg8: memref<4x8xf32, #tpu.memory_space<vmem>>) attributes {dimension_semantics = [#tpu.dimension_semantics<parallel>], iteration_bounds = array<i64: 1>, scalar_prefetch = 0 : i64, scratch_operands = 0 : i64, tpu.core_type = #tpu.core_type<tc>, window_params = [{transform_indices = @transform_0, window_bounds = array<i64: 8, 16>}, {pipeline_mode = #tpu.pipeline_mode<synchronous>, transform_indices = @transform_1, window_bounds = array<i64: 64, 16>}, {pipeline_mode = #tpu.pipeline_mode<synchronous>, transform_indices = @transform_2, window_bounds = array<i64: 64, 1>}, {pipeline_mode = #tpu.pipeline_mode<synchronous>, transform_indices = @transform_3, window_bounds = array<i64: 32, 64>}, {pipeline_mode = #tpu.pipeline_mode<synchronous>, transform_indices = @transform_4, window_bounds = array<i64: 32, 1>}, {pipeline_mode = #tpu.pipeline_mode<synchronous>, transform_indices = @transform_5, window_bounds = array<i64: 4, 32>}, {pipeline_mode = #tpu.pipeline_mode<synchronous>, transform_indices = @transform_6, window_bounds = array<i64: 4, 1>}, {transform_indices = @transform_7, window_bounds = array<i64: 4, 8>}]} {
    %c0 = arith.constant 0 : index
    %c0_0 = arith.constant 0 : index
    %0 = vector.load %arg1[%c0, %c0_0] : memref<8x16xf32, #tpu.memory_space<vmem>>, vector<8x16xf32>
    %1 = tpu.transpose %0, [1, 0] : vector<8x16xf32> -> vector<16x8xf32>
    %c0_1 = arith.constant 0 : index
    %c0_2 = arith.constant 0 : index
    %2 = vector.load %arg2[%c0_1, %c0_2] : memref<64x16xf32, #tpu.memory_space<vmem>>, vector<64x16xf32>
    %cst = arith.constant dense<0.000000e+00> : vector<64x8xf32>
    %3 = tpu.matmul %2, %1, %cst {dimension_numbers = #tpu.dot_dimension_numbers<[1], [0], [0], [1], [0, 0, 1, 1], [], []>} : vector<64x16xf32>, vector<16x8xf32>, vector<64x8xf32> -> vector<64x8xf32>
    %c0_3 = arith.constant 0 : index
    %c0_4 = arith.constant 0 : index
    %4 = vector.load %arg3[%c0_3, %c0_4] : memref<64x1xf32, #tpu.memory_space<vmem>>, vector<64x1xf32>
    %5 = vector.broadcast %4 : vector<64x1xf32> to vector<64x8xf32>
    %6 = arith.addf %3, %5 : vector<64x8xf32>
    %cst_5 = arith.constant 0.000000e+00 : f32
    %7 = vector.broadcast %cst_5 : f32 to vector<64x8xf32>
    %8 = arith.maximumf %6, %7 : vector<64x8xf32>
    %c0_6 = arith.constant 0 : index
    %c0_7 = arith.constant 0 : index
    %9 = vector.load %arg4[%c0_6, %c0_7] : memref<32x64xf32, #tpu.memory_space<vmem>>, vector<32x64xf32>
    %cst_8 = arith.constant dense<0.000000e+00> : vector<32x8xf32>
    %10 = tpu.matmul %9, %8, %cst_8 {dimension_numbers = #tpu.dot_dimension_numbers<[1], [0], [0], [1], [0, 0, 1, 1], [], []>} : vector<32x64xf32>, vector<64x8xf32>, vector<32x8xf32> -> vector<32x8xf32>
    %c0_9 = arith.constant 0 : index
    %c0_10 = arith.constant 0 : index
    %11 = vector.load %arg5[%c0_9, %c0_10] : memref<32x1xf32, #tpu.memory_space<vmem>>, vector<32x1xf32>
    %12 = vector.broadcast %11 : vector<32x1xf32> to vector<32x8xf32>
    %13 = arith.addf %10, %12 : vector<32x8xf32>
    %cst_11 = arith.constant 0.000000e+00 : f32
    %14 = vector.broadcast %cst_11 : f32 to vector<32x8xf32>
    %15 = arith.maximumf %13, %14 : vector<32x8xf32>
    %c0_12 = arith.constant 0 : index
    %c0_13 = arith.constant 0 : index
    %16 = vector.load %arg6[%c0_12, %c0_13] : memref<4x32xf32, #tpu.memory_space<vmem>>, vector<4x32xf32>
    %cst_14 = arith.constant dense<0.000000e+00> : vector<4x8xf32>
    %17 = tpu.matmul %16, %15, %cst_14 {dimension_numbers = #tpu.dot_dimension_numbers<[1], [0], [0], [1], [0, 0, 1, 1], [], []>} : vector<4x32xf32>, vector<32x8xf32>, vector<4x8xf32> -> vector<4x8xf32>
    %c0_15 = arith.constant 0 : index
    %c0_16 = arith.constant 0 : index
    %18 = vector.load %arg7[%c0_15, %c0_16] : memref<4x1xf32, #tpu.memory_space<vmem>>, vector<4x1xf32>
    %19 = vector.broadcast %18 : vector<4x1xf32> to vector<4x8xf32>
    %20 = arith.addf %17, %19 : vector<4x8xf32>
    %c0_17 = arith.constant 0 : index
    %c0_18 = arith.constant 0 : index
    %21 = vector.load %arg8[%c0_17, %c0_18] : memref<4x8xf32, #tpu.memory_space<vmem>>, vector<4x8xf32>
    tpu.vector_store %arg8[%c0_17, %c0_18], %20 {strides = array<i32>} : memref<4x8xf32, #tpu.memory_space<vmem>>, vector<4x8xf32>,
    return
  }
  func.func @transform_0(%arg0: i32) -> (i32, i32) {
    %c0_i32 = arith.constant 0 : i32
    %c0_i32_0 = arith.constant 0 : i32
    return %arg0, %c0_i32 : i32, i32
  }
  func.func @transform_1(%arg0: i32) -> (i32, i32) {
    %c0_i32 = arith.constant 0 : i32
    %c0_i32_0 = arith.constant 0 : i32
    %c0_i32_1 = arith.constant 0 : i32
    return %c0_i32, %c0_i32_0 : i32, i32
  }
  func.func @transform_2(%arg0: i32) -> (i32, i32) {
    %c0_i32 = arith.constant 0 : i32
    %c0_i32_0 = arith.constant 0 : i32
    %c0_i32_1 = arith.constant 0 : i32
    return %c0_i32, %c0_i32_0 : i32, i32
  }
  func.func @transform_3(%arg0: i32) -> (i32, i32) {
    %c0_i32 = arith.constant 0 : i32
    %c0_i32_0 = arith.constant 0 : i32
    %c0_i32_1 = arith.constant 0 : i32
    return %c0_i32, %c0_i32_0 : i32, i32
  }
  func.func @transform_4(%arg0: i32) -> (i32, i32) {
    %c0_i32 = arith.constant 0 : i32
    %c0_i32_0 = arith.constant 0 : i32
    %c0_i32_1 = arith.constant 0 : i32
    return %c0_i32, %c0_i32_0 : i32, i32
  }
  func.func @transform_5(%arg0: i32) -> (i32, i32) {
    %c0_i32 = arith.constant 0 : i32
    %c0_i32_0 = arith.constant 0 : i32
    %c0_i32_1 = arith.constant 0 : i32
    return %c0_i32, %c0_i32_0 : i32, i32
  }
  func.func @transform_6(%arg0: i32) -> (i32, i32) {
    %c0_i32 = arith.constant 0 : i32
    %c0_i32_0 = arith.constant 0 : i32
    %c0_i32_1 = arith.constant 0 : i32
    return %c0_i32, %c0_i32_0 : i32, i32
  }
  func.func @transform_7(%arg0: i32) -> (i32, i32) {
    %c0_i32 = arith.constant 0 : i32
    %c0_i32_0 = arith.constant 0 : i32
    return %c0_i32, %arg0 : i32, i32
  }
}

</mosaic_0001>

<bundles_post_ra>
// kernel: tabular_nn_forward.1
= control target key start
LH: loop header
LB: loop body
LE: loop exit
PB: predicated region body
PF: predicated region fallthrough
CT: control target
= control target key end

     0   :  { %vm84_vm0 = vcmask 130048   ;;  %v567_v3 = vmov 0   ;;  %s709_s0 = inlined_call_operand.vmem [shape: f32[8,16], index: 0, kind: input, shape index: {}]   ;;  %s710_s1 = inlined_call_operand.vmem [shape: f32[64,16], index: 1, kind: input, shape index: {}]   ;;  %s711_s2 = inlined_call_operand.vmem [shape: f32[64,1], index: 2, kind: input, shape index: {}]   ;;  %s712_s3 = inlined_call_operand.vmem [shape: f32[32,64], index: 3, kind: input, shape index: {}]   ;;  %s713_s4 = inlined_call_operand.vmem [shape: f32[32,1], index: 4, kind: input, shape index: {}]   ;;  %s714_s5 = inlined_call_operand.vmem [shape: f32[4,32], index: 5, kind: input, shape index: {}]   ;;  %s715_s6 = inlined_call_operand.vmem [shape: f32[4,1], index: 6, kind: input, shape index: {}]   ;;  %s716_s7 = inlined_call_operand.hbm [shape: f32[4,8], index: 7, kind: output, shape index: {}]  }
   0x1   :  { %v27_v0 = vld [vmem:[%s709_s0] sm:$0xff]  ;;  %v29_v2 = vld [vmem:[%s710_s1 + $0x8] sm:$0xff]  ;;  %543 = vset.pattern.permute.xlu0 %v567_v3  ;;  %v30_v4 = vld [vmem:[%s710_s1 + $0x10] sm:$0xff]  ;;  %544 = vset.pattern.permute.xlu1 %v567_v3 }
   0x2   :  { %v28_v1 = vld [vmem:[%s710_s1] sm:$0xff]  ;;  %492 = vmatprep.subr.msk.mxu0 %vm84_vm0, %v27_v0  ;;  %v43_v5 = vld [vmem:[%s711_s2 + $0x38] sm:$0xff]  ;;  %v41_v6 = vld [vmem:[%s711_s2 + $0x28] sm:$0xff] }
   0x3   :  { %494 = vmatprep.mubr.msk.f32.mxu0 %vm84_vm0, %v28_v1  ;;  %493 = vmatpush3.xpose.msk.msra.mxu0 %vm84_vm0, %v27_v0  ;;  %v42_v7 = vld [vmem:[%s711_s2 + $0x30] sm:$0xff]  ;;  %v40_v8 = vld [vmem:[%s711_s2 + $0x20] sm:$0xff]  ;;  %v31_v9 = vld [vmem:[%s710_s1 + $0x18] sm:$0xff] }
   0x4   :  { %81 = vperm.xlu0 %543, %v43_v5   ;;  %71 = vperm.xlu1 %544, %v41_v6   ;;  %v32_v10 = vld [vmem:[%s710_s1 + $0x20] sm:$0xff] }
   0x6   :  { %495 = vmatmul.mubr.msk.f32.vlgmr.msra.gmra.mxu0 %vm84_vm0, %v29_v2 }
   0x7   :  { %497 = vmatprep.mubr.msk.f32.mxu0 %vm84_vm0, %v30_v4 }
   0x8   :  { %12 = vsyncpa [#allocation3], 0  ;;  %76 = vperm.xlu0 %543, %v42_v7   ;;  %66 = vperm.xlu1 %544, %v40_v8   ;;  %v39_v11 = vld [vmem:[%s711_s2 + $0x18] sm:$0xff]  ;;  %v38_v12 = vld [vmem:[%s711_s2 + $0x10] sm:$0xff]  ;;  %vm253_vm1 = vcmask 523264   ;;  %v568_v59 = vmov 0.0  }
   0x9   :  { %v33_v13 = vld [vmem:[%s710_s1 + $0x28] sm:$0xff]  ;;  %v34_v14 = vld [vmem:[%s710_s1 + $0x30] sm:$0xff]  ;;  %v36_v16 = vld [vmem:[%s711_s2] sm:$0xff]  ;;  %528 = vmatprep.subr.mxu0 %v568_v59  ;;  %vm569_vm2 = vmmov 0   ;;  %vm362_vm3 = vcmask 261120   ;;  %s570_s25 = smov [#allocation2]  }
   0xa   :  { %498 = vmatmul.mubr.msk.f32.gmra.mxu0 %vm84_vm0, %v31_v9  ;;  %v37_v15 = vld [vmem:[%s711_s2 + $0x8] sm:$0xff]  ;;  %v35_v17 = vld [vmem:[%s710_s1 + $0x38] sm:$0xff]  ;;  %v231_v19 = vld [vmem:[%s713_s4 + $0x10] sm:$0xff]  ;;  %s444_s26 = sshll.u32 %s570_s25, 4  ;;  %vm436_vm4 = vcmask 60416   ;;  %s445_s26 = int_to_ptr.vmem [resolvable:$true] %s444_s26 }
   0xb   :  { %500 = vmatprep.mubr.msk.f32.mxu0 %vm84_vm0, %v32_v10  ;;  %v232_v18 = vld [vmem:[%s713_s4 + $0x18] sm:$0xff]  ;;  %v230_v20 = vld [vmem:[%s713_s4 + $0x8] sm:$0xff]  ;;  %v229_v21 = vld [vmem:[%s713_s4] sm:$0xff]  ;;  %s545_s27 = scalar_lea.vmem %s445_s26, 64  ;;  %p550_p1 = scmp.lt.s32.totalorder %s445_s26, %s445_s26 }
   0xc   :  { %61 = vperm.xlu0 %543, %v39_v11   ;;  %56 = vperm.xlu1 %544, %v38_v12   ;;  %v356_v22 = vld [vmem:[%s715_s6] sm:$0xf]  ;;  %v226_v56 = vld [vmem:[%s712_s3 + $0x8] sm:$0xff]  ;;  %v227_v57 = vld [vmem:[%s712_s3 + $0x10] sm:$0xff]  ;;  %p546_p0 = scmp.ne.s32.totalorder %s445_s26, %s545_s27  ;;  %p551_p2 = scmp.lt.s32.totalorder %s545_s27, %s545_s27 }
   0xd   :  { %v225_v23 = vld [vmem:[%s712_s3] sm:$0xff]  ;;  %v228_v58 = vld [vmem:[%s712_s3 + $0x18] sm:$0xff] }
   0xe   :  { %501 = vmatmul.mubr.msk.f32.gmra.mxu0 %vm84_vm0, %v33_v13  ;;  %522 = vmatprep.mubr.msk.f32.mxu1 %vm253_vm1, %v225_v23  ;;  %v355_v12 = vld [vmem:[%s714_s5] sm:$0xf]  ;;  %p552_p3 = por %p551_p2, %p550_p1 }
   0xf   :  { %503 = vmatprep.mubr.msk.f32.mxu0 %vm84_vm0, %v34_v14 }
  0x10   :  { %51 = vperm.xlu0 %543, %v37_v15   ;;  %46 = vperm.xlu1 %544, %v36_v16   ;;  %p553_p4 = pnand %p552_p3, %p546_p0 }
  0x12   :  { %504 = vmatmul.mubr.msk.f32.gmra.mxu0 %vm84_vm0, %v35_v17 }
  0x13   :  { %536 = vmatprep.mubr.msk.f32.mxu0 %vm569_vm2, %v568_v59 }
  0x14   :  { %250 = vperm.xlu0 %543, %v232_v18   ;;  %245 = vperm.xlu1 %544, %v231_v19  }
  0x18   :  { %240 = vperm.xlu0 %543, %v230_v20   ;;  %235 = vperm.xlu1 %544, %v229_v21  }
  0x1c   :  { %359 = vperm.xlu0 %543, %v356_v22  }
  0x7f   :  { %v82_v26 = vpop.permute.xlu0 %81  ;;  %v72_v27 = vpop.permute.xlu1 %71 }
  0x83   :  { %v77_v31 = vpop.permute.xlu0 %76  ;;  %v67_v32 = vpop.permute.xlu1 %66 }
  0x87   :  { %v62_v40 = vpop.permute.xlu0 %61  ;;  %v57_v41 = vpop.permute.xlu1 %56 }
  0x8b   :  { %v52_v48 = vpop.permute.xlu0 %51  ;;  %v47_v49 = vpop.permute.xlu1 %46 }
  0x8f   :  { %v251_v60 = vpop.permute.xlu0 %250  ;;  %v246_v62 = vpop.permute.xlu1 %245 }
  0x93   :  { %v241_v2 = vpop.permute.xlu0 %240  ;;  %v236_v7 = vpop.permute.xlu1 %235 }
  0x97   :  { %v360_v13 = vpop.permute.xlu0 %359 }
  0xc6   :  { %v496_v24 = vpop.f32.mrf.mxu0 }
  0xc7   :  { %v184_v50 = vadd.f32 %v496_v24, %v52_v48 }
  0xc8   :  { %v178_v25 = vpop.f32.mrf.mxu0 }
  0xc9   :  { %v179_v52 = vadd.f32 %v178_v25, %v47_v49  ;;  %v218_v54 = vmax.f32 %v184_v50, 0.0 }
  0xca   :  { %v499_v28 = vpop.f32.mrf.mxu0 }
  0xcb   :  { %v194_v44 = vadd.f32 %v499_v28, %v62_v40  ;;  %v217_v55 = vmax.f32 %v179_v52, 0.0 }
  0xcc   :  { %v188_v29 = vpop.f32.mrf.mxu0 }
  0xcd   :  { %v189_v46 = vadd.f32 %v188_v29, %v57_v41  ;;  %v220_v51 = vmax.f32 %v194_v44, 0.0 }
  0xce   :  { %v502_v30 = vpop.f32.mrf.mxu0 }
  0xcf   :  { %v204_v37 = vadd.f32 %v502_v30, %v72_v27  ;;  %v219_v53 = vmax.f32 %v189_v46, 0.0 }
  0xd0   :  { %v198_v33 = vpop.f32.mrf.mxu0 }
  0xd1   :  { %v199_v42 = vadd.f32 %v198_v33, %v67_v32  ;;  %v222_v45 = vmax.f32 %v204_v37, 0.0 }
  0xd2   :  { %v505_v34 = vpop.f32.mrf.mxu0 }
  0xd3   :  { %v214_v35 = vadd.f32 %v505_v34, %v82_v26  ;;  %v221_v47 = vmax.f32 %v199_v42, 0.0 }
  0xd4   :  { %v208_v36 = vpop.f32.mrf.mxu0 }
  0xd5   :  { %v224_v38 = vmax.f32 %v214_v35, 0.0  ;;  %v209_v39 = vadd.f32 %v208_v36, %v77_v31 }
  0xd7   :  { %v223_v43 = vmax.f32 %v209_v39, 0.0  ;;  %506 = vmatprep.subr.mxu1 %v224_v38 }
  0xd8   :  { %507 = vmatpush3.msra.mxu1 %v224_v38 }
  0xd9   :  { %508 = vmatprep.subr.mxu1 %v223_v43 }
  0xda   :  { %509 = vmatpush3.msra.mxu1 %v223_v43 }
  0xdb   :  { %510 = vmatprep.subr.mxu1 %v222_v45 }
  0xdc   :  { %511 = vmatpush3.msra.mxu1 %v222_v45 }
  0xdd   :  { %512 = vmatprep.subr.mxu1 %v221_v47 }
  0xde   :  { %513 = vmatpush3.msra.mxu1 %v221_v47 }
  0xdf   :  { %514 = vmatprep.subr.mxu1 %v220_v51 }
  0xe0   :  { %515 = vmatpush3.msra.mxu1 %v220_v51 }
  0xe1   :  { %516 = vmatprep.subr.mxu1 %v219_v53 }
  0xe2   :  { %517 = vmatpush3.msra.mxu1 %v219_v53 }
  0xe3   :  { %518 = vmatprep.subr.mxu1 %v218_v54 }
  0xe4   :  { %519 = vmatpush3.msra.mxu1 %v218_v54 }
  0xe5   :  { %520 = vmatprep.subr.mxu1 %v217_v55 }
  0xe6   :  { %521 = vmatpush3.msra.mxu1 %v217_v55 }
  0xe7   :  { %523 = vmatmul.mubr.msk.f32.vlgmr.msra.gmra.mxu1 %vm253_vm1, %v226_v56 }
  0xe8   :  { %525 = vmatprep.mubr.msk.f32.mxu1 %vm253_vm1, %v227_v57 }
  0xeb   :  { %526 = vmatmul.mubr.msk.f32.gmra.mxu1 %vm253_vm1, %v228_v58 }
 0x1a7   :  { %v524_v61 = vpop.f32.mrf.mxu1 }
 0x1a8   :  { %v338_v4 = vadd.f32 %v524_v61, %v241_v2 }
 0x1a9   :  { %v332_v63 = vpop.f32.mrf.mxu1 }
 0x1aa   :  { %v333_v8 = vadd.f32 %v332_v63, %v236_v7  ;;  %v352_v10 = vmax.f32 %v338_v4, 0.0 }
 0x1ab   :  { %v527_v0 = vpop.f32.mrf.mxu1 }
 0x1ac   :  { %v348_v1 = vadd.f32 %v527_v0, %v251_v60  ;;  %v351_v11 = vmax.f32 %v333_v8, 0.0 }
 0x1ad   :  { %v342_v3 = vpop.f32.mrf.mxu1 }
 0x1ae   :  { %v354_v5 = vmax.f32 %v348_v1, 0.0  ;;  %v343_v6 = vadd.f32 %v342_v3, %v246_v62 }
 0x1b0   :  { %v353_v9 = vmax.f32 %v343_v6, 0.0  ;;  %529 = vmatpush3.msra.mxu0 %v354_v5 }
 0x1b1   :  { %530 = vmatprep.subr.mxu0 %v568_v59 }
 0x1b2   :  { %531 = vmatpush3.msra.mxu0 %v353_v9 }
 0x1b3   :  { %532 = vmatprep.subr.mxu0 %v568_v59 }
 0x1b4   :  { %533 = vmatpush3.msra.mxu0 %v352_v10 }
 0x1b5   :  { %534 = vmatprep.subr.mxu0 %v568_v59 }
 0x1b6   :  { %535 = vmatpush3.msra.mxu0 %v351_v11 }
 0x1b7   :  { %537 = vmatmul.mubr.msk.f32.vlgmr.msra.gmra.mxu0 %vm362_vm3, %v355_v12 }
 0x277   :  { %v432_v14 = vpop.f32.mrf.mxu0 }
 0x278   :  { %v433_v15 = vadd.f32 %v432_v14, %v360_v13 }
 0x279   :  { %v538_v16 = vpop.f32.mrf.mxu0 }
 0x27a   :  { %437 = vst.msk [vmem:[#allocation2] sm:$0xf] %vm436_vm4, %v433_v15 }
 0x27b   :  { %556 = shalt.err (!%p553_p4)
}
 0x27c   :  { %447 = dma.vmem_to_hbm [thread:$0]  %s445_s26, 64, %s716_s7, [#allocation3]  }
 0x27d   :  { %565 = dma.done.wait [#allocation3], 64  }
 0x27e   :  { %566 = vsyncadd [#allocation3], 4294967232 }
 0x27f   :  { %451 = vsyncpa [#allocation3], 1 }

</bundles_post_ra>
